<compile_context>
chip_gen: v7x
topology: tpu7x:2x2x1
jax: 0.10.0
libtpu: 0.0.40
codegen_flags: <defaults>
</compile_context>

<pallas_src>
import functools

import numpy as np
import jax
import jax.numpy as jnp
from jax import lax
from jax.experimental import pallas as pl
from jax.experimental.pallas import tpu as pltpu

_LANES = 128
_MAX_BLOCK_ROWS = 4096            # 4096 x 128 f32 = 2 MiB/tile
_VMEM_LIMIT = 32 * 1024 * 1024    # headroom; <= physical on v5e/v6e/v7x

_GOLDEN = np.uint32(0x9E3779B9)
_M1 = np.uint32(0x7FEB352D)
_M2 = np.uint32(0x846CA68B)

_OPS_PER_ELEM = 15                # approx VPU ops/element (for the CostEstimate)


# ---------------- in-kernel helpers ----------------

def _hash_bits(seed_u32, idx_u32):
    """Counter-based integer hash (trimmed lowbias32) -> uniform uint32 per (seed, index).

    The leading `v ^= v >> 16` round is dropped: the entropy of the flat element index is
    in the low bits, so that round contributed nothing; removal trims VALU work (v7x)."""
    v = idx_u32 ^ (seed_u32 * _GOLDEN)
    v = v * _M1
    v = v ^ (v >> 15)
    v = v * _M2
    v = v ^ (v >> 16)
    return v


def _keep_mask(seed_ref, shape, threshold):
    """Boolean keep-mask for the current (block_rows, 128) tile.

    Keyed on the flat element index so the realized mask is independent of the tile size /
    grid layout and identical between the mask-materialization and apply kernels."""
    seed = seed_ref[0].astype(jnp.uint32)
    r = lax.broadcasted_iota(jnp.int32, shape, 0).astype(jnp.uint32)
    c = lax.broadcasted_iota(jnp.int32, shape, 1).astype(jnp.uint32)
    base = (pl.program_id(0) * shape[0]).astype(jnp.uint32)
    idx = (base + r) * np.uint32(shape[1]) + c
    return _hash_bits(seed, idx) >= np.uint32(threshold)


# ---------------- kernels ----------------

def _mask_kernel(seed_ref, mask_ref, *, threshold, scale):
    keep = _keep_mask(seed_ref, mask_ref.shape, threshold)
    mask_ref[...] = jnp.where(keep, scale, 0.0).astype(mask_ref.dtype)


def _apply_kernel(seed_ref, x_ref, out_ref, *, threshold, p, dropout_spikes):
    keep = _keep_mask(seed_ref, x_ref.shape, threshold)
    x = x_ref[...]
    if dropout_spikes:
        # mul(mask, x) == mask * x.bool()   (multiply_spike.forward semantics)
        s = 1.0 / (1.0 - p)
        out = jnp.where(keep & (x != 0), s, 0.0).astype(out_ref.dtype)
    else:
        # x * mask / (1 - p); the mask already carries 1/(1-p) -> one fused constant.
        # (The double 1/(1-p) scaling matches the PyTorch module exactly.)
        c = (1.0 / (1.0 - p)) ** 2
        out = jnp.where(keep, x * c, jnp.zeros_like(x)).astype(out_ref.dtype)
    out_ref[...] = out


# ---------------- wrappers ----------------

def _round_up(a, b):
    return -(-a // b) * b


def _layout(rows):
    """(block_rows, grid): the largest tile that fits comfortably in scoped VMEM while
    guaranteeing grid >= 2 whenever rows > 8 (so v7x can shard the 'parallel' axis over
    both TensorCores). Partial last blocks are handled by Pallas boundary clipping."""
    if rows <= 8:
        return rows, 1
    block_rows = min(_MAX_BLOCK_ROWS, _round_up(-(-rows // 2), 8))
    return block_rows, -(-rows // block_rows)


def _threshold(p):
    t = int(round(p * (1 << 32)))
    return max(1, min(t, (1 << 32) - 1))


def _compiler_params():
    return pltpu.CompilerParams(dimension_semantics=("parallel",),
                                vmem_limit_bytes=_VMEM_LIMIT)


def _check_size(total):
    if total >= (1 << 32):
        raise ValueError("td_Dropout Pallas kernel indexes elements with uint32; "
                         f"tensor has {total} elements (>= 2**32).")


def create_mask_pallas(shape, dtype, p, seed):
    """Materialize the {0, 1/(1-p)} mask (only used if layer.mask is inspected)."""
    total = int(np.prod(shape))
    _check_size(total)
    rows = -(-total // _LANES)
    block_rows, grid = _layout(rows)
    mask2d = pl.pallas_call(
        functools.partial(_mask_kernel, threshold=_threshold(p), scale=1.0 / (1.0 - p)),
        out_shape=jax.ShapeDtypeStruct((rows, _LANES), jnp.float32),
        grid=(grid,),
        in_specs=[pl.BlockSpec(memory_space=pltpu.SMEM)],
        out_specs=pl.BlockSpec((block_rows, _LANES), lambda i: (i, 0)),
        compiler_params=_compiler_params(),
    )(jnp.asarray([seed], jnp.int32))
    return mask2d.reshape(-1)[:total].reshape(shape).astype(dtype)


@functools.partial(jax.jit, static_argnames=("p", "dropout_spikes"))
def _apply_dropout(x, seed_arr, *, p, dropout_spikes):
    shape = x.shape
    total = int(np.prod(shape))
    _check_size(total)
    aligned = (total % _LANES == 0)
    if aligned:
        rows = total // _LANES
        x2d = x.reshape(rows, _LANES)          # free reshape, no extra HBM pass
    else:
        # TODO(synk): handle the ragged tail in-kernel with a masked store instead of a
        # padded copy + slice (extra HBM round-trips on non-128-aligned element counts).
        rows = -(-total // _LANES)
        x2d = jnp.pad(x.reshape(-1), (0, rows * _LANES - total)).reshape(rows, _LANES)
    block_rows, grid = _layout(rows)
    cost = pl.CostEstimate(
        flops=_OPS_PER_ELEM * rows * _LANES,
        transcendentals=0,
        bytes_accessed=2 * rows * _LANES * x.dtype.itemsize,
    )
    out2d = pl.pallas_call(
        functools.partial(_apply_kernel, threshold=_threshold(p), p=p,
                          dropout_spikes=dropout_spikes),
        out_shape=jax.ShapeDtypeStruct((rows, _LANES), x.dtype),
        grid=(grid,),
        in_specs=[pl.BlockSpec(memory_space=pltpu.SMEM),
                  pl.BlockSpec((block_rows, _LANES), lambda i: (i, 0))],
        out_specs=pl.BlockSpec((block_rows, _LANES), lambda i: (i, 0)),
        compiler_params=_compiler_params(),
        cost_estimate=cost,
    )(seed_arr, x2d)
    if aligned:
        return out2d.reshape(shape)
    return out2d.reshape(-1)[:total].reshape(shape)


class TdDropout:
    """Pallas port of td_Dropout (forward only). Mask is stateful: fixed after the first
    forward and re-randomized only after reset()."""
    # TODO(synk): autograd backward of multiply_spike / spike_multiply_spike not ported.

    def __init__(self, p=0.5, dropout_spikes=False):
        assert 0 < p < 1
        self.p = p
        self.dropout_spikes = dropout_spikes
        self.training = True
        self._seed = None
        self._mask_cache = None
        self._mask_shape = None
        self._mask_dtype = None

    @property
    def mask(self):
        if self._seed is None:
            return None
        if self._mask_cache is None:
            self._mask_cache = create_mask_pallas(
                self._mask_shape, self._mask_dtype, self.p, self._seed)
        return self._mask_cache

    def create_mask(self, x, seed=0):
        self._seed = int(seed)
        self._mask_shape = tuple(x.shape)
        self._mask_dtype = x.dtype
        self._mask_cache = None

    def __call__(self, x, seed=0):
        if not self.training:
            return x
        if self._seed is None:
            self.create_mask(x, seed)
        seed_arr = jnp.asarray([self._seed], jnp.int32)
        return _apply_dropout(x, seed_arr, p=self.p, dropout_spikes=self.dropout_spikes)

    def reset(self):
        self._seed = None
        self._mask_cache = None
        self._mask_shape = None
        self._mask_dtype = None


# ---------------- demo / correctness check ----------------

if __name__ == "__main__":
    key = jax.random.PRNGKey(0)
    kx, ks = jax.random.split(key)

    p = 0.5
    x = jax.random.normal(kx, (2, 4, 16, 16), dtype=jnp.float32)          # NCHW
    spikes = (jax.random.uniform(ks, (2, 4, 16, 16)) > 0.5).astype(jnp.float32)

    # Path 1: dropout_spikes=False  (out = x * mask / (1 - p))
    layer = TdDropout(p=p, dropout_spikes=False)
    y = jax.block_until_ready(layer(x, seed=42))
    mask = layer.mask
    scale = 1.0 / (1.0 - p)
    # mask values must be exactly {0, 1/(1-p)}
    assert bool(jnp.all((mask == 0) | (jnp.abs(mask - scale) < 1e-6)))
    # keep fraction should be roughly 1-p
    frac = float(jnp.mean((mask != 0).astype(jnp.float32)))
    assert abs(frac - (1.0 - p)) < 0.15, frac
    ref = x * mask / (1.0 - p)
    np.testing.assert_allclose(np.asarray(y), np.asarray(ref), rtol=1e-6, atol=1e-6)
    # second call reuses the same mask (stateful behaviour)
    y2 = jax.block_until_ready(layer(x))
    np.testing.assert_allclose(np.asarray(y2), np.asarray(ref), rtol=1e-6, atol=1e-6)

    # Path 2: dropout_spikes=True  (out = mask * x.bool())
    layer_s = TdDropout(p=p, dropout_spikes=True)
    ys = jax.block_until_ready(layer_s(spikes, seed=7))
    ref_s = layer_s.mask * (spikes != 0).astype(jnp.float32)
    np.testing.assert_allclose(np.asarray(ys), np.asarray(ref_s), rtol=1e-6, atol=1e-6)

    # reset() re-randomizes on the next forward
    layer.reset()
    _ = jax.block_until_ready(layer(x, seed=123))

    # Eval mode: identity
    layer.training = False
    ye = jax.block_until_ready(layer(x))
    np.testing.assert_allclose(np.asarray(ye), np.asarray(x))

    print("KERNEL_OK")
</pallas_src>

<mosaic_0001>
module attributes {stable_mosaic.version = 11 : i64} {
  func.func @_apply_kernel(%arg0: i32, %arg1: memref<1xi32, #tpu.memory_space<smem>>, %arg2: memref<8x128xf32, #tpu.memory_space<vmem>>, %arg3: memref<8x128xf32, #tpu.memory_space<vmem>>) attributes {dimension_semantics = [#tpu.dimension_semantics<parallel>], iteration_bounds = array<i64: 2>, scalar_prefetch = 0 : i64, scratch_operands = 0 : i64, tpu.core_type = #tpu.core_type<tc>, window_params = [{transform_indices = @transform_0, window_bounds = array<i64: 1>}, {transform_indices = @transform_1, window_bounds = array<i64: 8, 128>}, {transform_indices = @transform_2, window_bounds = array<i64: 8, 128>}]} {
    %c0 = arith.constant 0 : index
    %0 = memref.load %arg1[%c0] : memref<1xi32, #tpu.memory_space<smem>>
    %1 = tpu.iota {dimensions = array<i32: 0>} : vector<8x128xi32>
    %2 = tpu.iota {dimensions = array<i32: 1>} : vector<8x128xi32>
    %c8_i32 = arith.constant 8 : i32
    %3 = arith.muli %arg0, %c8_i32 : i32
    %4 = vector.broadcast %3 : i32 to vector<8x128xi32>
    %5 = arith.addi %4, %1 : vector<8x128xi32>
    %c128_i32 = arith.constant 128 : i32
    %6 = vector.broadcast %c128_i32 : i32 to vector<8x128xi32>
    %7 = arith.muli %5, %6 : vector<8x128xi32>
    %8 = arith.addi %7, %2 : vector<8x128xi32>
    %c-1640531527_i32 = arith.constant -1640531527 : i32
    %9 = arith.muli %0, %c-1640531527_i32 : i32
    %10 = vector.broadcast %9 : i32 to vector<8x128xi32>
    %11 = arith.xori %8, %10 : vector<8x128xi32>
    %c2146121005_i32 = arith.constant 2146121005 : i32
    %12 = vector.broadcast %c2146121005_i32 : i32 to vector<8x128xi32>
    %13 = arith.muli %11, %12 : vector<8x128xi32>
    %c15_i32 = arith.constant 15 : i32
    %14 = vector.broadcast %c15_i32 : i32 to vector<8x128xi32>
    %15 = arith.shrui %13, %14 : vector<8x128xi32>
    %16 = arith.xori %13, %15 : vector<8x128xi32>
    %c-2073254261_i32 = arith.constant -2073254261 : i32
    %17 = vector.broadcast %c-2073254261_i32 : i32 to vector<8x128xi32>
    %18 = arith.muli %16, %17 : vector<8x128xi32>
    %c16_i32 = arith.constant 16 : i32
    %19 = vector.broadcast %c16_i32 : i32 to vector<8x128xi32>
    %20 = arith.shrui %18, %19 : vector<8x128xi32>
    %21 = arith.xori %18, %20 : vector<8x128xi32>
    %c-2147483648_i32 = arith.constant -2147483648 : i32
    %22 = vector.broadcast %c-2147483648_i32 : i32 to vector<8x128xi32>
    %23 = arith.cmpi uge, %21, %22 : vector<8x128xi32>
    %c0_0 = arith.constant 0 : index
    %c0_1 = arith.constant 0 : index
    %24 = vector.load %arg2[%c0_0, %c0_1] : memref<8x128xf32, #tpu.memory_space<vmem>>, vector<8x128xf32>
    %cst = arith.constant 4.000000e+00 : f32
    %25 = vector.broadcast %cst : f32 to vector<8x128xf32>
    %26 = arith.mulf %24, %25 : vector<8x128xf32>
    %cst_2 = arith.constant 0.000000e+00 : f32
    %27 = vector.broadcast %cst_2 : f32 to vector<8x128xf32>
    %28 = arith.select %23, %26, %27 : vector<8x128xi1>, vector<8x128xf32>
    %c0_3 = arith.constant 0 : index
    %c0_4 = arith.constant 0 : index
    %29 = vector.load %arg3[%c0_3, %c0_4] : memref<8x128xf32, #tpu.memory_space<vmem>>, vector<8x128xf32>
    tpu.vector_store %arg3[%c0_3, %c0_4], %28 {strides = array<i32>} : memref<8x128xf32, #tpu.memory_space<vmem>>, vector<8x128xf32>,
    return
  }
  func.func @transform_0(%arg0: i32) -> i32 {
    %c0_i32 = arith.constant 0 : i32
    %c0_i32_0 = arith.constant 0 : i32
    return %c0_i32 : i32
  }
  func.func @transform_1(%arg0: i32) -> (i32, i32) {
    %c0_i32 = arith.constant 0 : i32
    %c0_i32_0 = arith.constant 0 : i32
    return %arg0, %c0_i32 : i32, i32
  }
  func.func @transform_2(%arg0: i32) -> (i32, i32) {
    %c0_i32 = arith.constant 0 : i32
    %c0_i32_0 = arith.constant 0 : i32
    return %arg0, %c0_i32 : i32, i32
  }
}

</mosaic_0001>

<bundles_post_ra>
// kernel: _apply_dropout.1
= control target key start
LH: loop header
LB: loop body
LE: loop exit
PB: predicated region body
PF: predicated region fallthrough
CT: control target
= control target key end

     0   :  { %s261_s11 = smov 0   ;;  %s278_s0 = inlined_call_operand.<no memory space> [shape: s32[1], index: 0, kind: input, shape index: {}]   ;;  %s279_s1 = inlined_call_operand.vmem [shape: f32[16,128], index: 1, kind: input, shape index: {}]   ;;  %s280_s2 = inlined_call_operand.vmem [shape: f32[16,128], index: 2, kind: output, shape index: {}]  }
   0x1   :  { %7 = sst [smem:[#allocation2]] %s278_s0 }
   0x2 LB: > { %s217_s12 = sadd.s32 4294967295, %s241_s11   ;;  %p221_p0 = scmp.ge.s32.totalorder %s241_s11, 1  ;;  %s241_s11 = sphi %s261_s11, %s13_s11  }
   0x3   : > { %p112_p1 = scmp.lt.s32.totalorder %s241_s11, 3 }
   0x5   : > { %p113_p2 = pnand %p221_p0, %p112_p1 }
   0x6   : > { %s140_s13 = sld [smem:[#allocation2]] (!%p113_p2)  ;;  %v141_v0 = vlaneseq (!%p113_p2)  ;;  %s224_s14 = sshll.u32 (!%p113_p2), %s217_s12, 3 }
   0x7   : > { %116 = sbr.rel (%p113_p2) target bundleno = 33 (0x21), region = 28  ;;  %v146_v2 = vstv (!%p113_p2), %s224_s14  ;;  %p132_p3 = scmp.lt.s32.totalorder (!%p113_p2), %s217_s12, 1 }
   0x8   : > { %v142_v1 = vshrl.u32 (!%p113_p2), %v141_v0, 7  ;;  %v144_v3 = vand.u32 (!%p113_p2), 127, %v141_v0 }
   0xa   : > { %v147_v4 = vadd.s32 (!%p113_p2), %v146_v2, %v142_v1 }
   0xc   : > { %v148_v5 = vmul.u32 (!%p113_p2), 128, %v147_v4  ;;  %s150_s0 = smul.u32 (!%p113_p2), 2654435769, %s140_s13 }
   0xe   : > { %s282_s12 = smov (!%p132_p3, %s217_s12), 1  ;;  %v149_v6 = vadd.s32 %v148_v5, %v144_v3  ;;  %v151_v7 = vstv %s150_s0 }
   0xf   : > { %s222_s15 = sshll.u32 %s282_s12, 3 }
  0x10   : > { %v152_v8 = vxor.u32 %v151_v7, %v149_v6  ;;  %s135_s18 = scalar_lea.vmem %s279_s1, %s222_s15  ;;  %s139_s21 = scalar_lea.vmem %s280_s2, %s222_s15 }
  0x11   : > { %v160_v13 = vld [vmem:[%s135_s18] sm:$0xff] }
  0x12   : > { %v153_v9 = vmul.u32 2146121005, %v152_v8  ;;  %v161_v15 = vmul.f32 4.0, %v160_v13 }
  0x14   : > { %v154_v10 = vshrl.u32 %v153_v9, 15 }
  0x16   : > { %v155_v11 = vxor.u32 %v154_v10, %v153_v9 }
  0x18   : > { %v156_v12 = vmul.u32 2221713035, %v155_v11 }
  0x1a   : > { %v157_v14 = vshrl.u32 %v156_v12, 16 }
  0x1c   : > { %v158_v16 = vxor.u32 %v157_v14, %v156_v12 }
  0x1e   : > { %vm159_vm0 = vcmp.ge.u32.totalorder %v158_v16, 2147483648 }
  0x1f   : > { %v162_v17 = vsel %vm159_vm0, %v161_v15, 0.0 }
  0x20   : > { %163 = vst [vmem:[%s139_s21] sm:$0xff] %v162_v17 }
  0x21 PF: > { %s13_s11 = sadd.s32 1, %s241_s11  }
  0x22   : > { %p10_p4 = scmp.ge.s32.totalorder %s13_s11, 4  }
  0x24   :  { %12 = sbr.rel (!%p10_p4) target bundleno = 2 (0x2), region = 58 }

</bundles_post_ra>
